<compile_context>
chip_gen: v7x
topology: tpu7x:2x2x1
jax: 0.10.0
libtpu: 0.0.40
codegen_flags: <defaults>
</compile_context>

<pallas_src>
import jax
import jax.numpy as jnp
from jax.experimental import pallas as pl
from jax.experimental.pallas import tpu as pltpu

HIDDEN = 768
LENGTH = 2          # forced to 2 by the (-1, -lenght) slice (see note above)
NUM_CLASSES = 3
N_PAD = 128         # lane-padded output width


def head_gather_linear(last_hidden_state, w_pad, b_pad):
    """out_padded = concat(h[:, S-1], h[:, S-LENGTH]) @ w_pad + b_pad.

    last_hidden_state : (B, S, HIDDEN) f32, kept in HBM; only 2 rows/batch are DMA'd.
    w_pad             : (LENGTH*HIDDEN, N_PAD) bf16 (torch Linear.weight^T, zero-padded).
    b_pad             : (1, N_PAD) f32.
    returns           : (B, N_PAD) f32 (caller slices [:, :NUM_CLASSES]).
    """
    B, S, H = last_hidden_state.shape
    assert H == HIDDEN
    F, n_pad = w_pad.shape
    assert F == LENGTH * HIDDEN and n_pad == N_PAD

    def kernel(h_hbm, w_ref, b_ref, o_ref, x_vmem, sem):
        # Fused gather: DMA only the two selected sequence positions from HBM.
        # Position order matches torch's (-1, -lenght) => [S-1, S-LENGTH].
        cp0 = pltpu.make_async_copy(
            h_hbm.at[:, pl.ds(S - 1, 1), :], x_vmem.at[:, pl.ds(0, 1), :], sem.at[0]
        )
        cp1 = pltpu.make_async_copy(
            h_hbm.at[:, pl.ds(S - LENGTH, 1), :], x_vmem.at[:, pl.ds(1, 1), :], sem.at[1]
        )
        cp0.start()
        cp1.start()
        cp0.wait()
        cp1.wait()

        # Two MXU dots (one per gathered position) avoid any in-kernel reshape;
        # bf16 operands, f32 accumulation.
        x0 = x_vmem[:, 0, :].astype(jnp.bfloat16)            # (B, 768)  == h[:, S-1, :]
        x1 = x_vmem[:, 1, :].astype(jnp.bfloat16)            # (B, 768)  == h[:, S-LENGTH, :]
        acc = jnp.dot(x0, w_ref[0:HIDDEN, :], preferred_element_type=jnp.float32)
        acc = acc + jnp.dot(
            x1, w_ref[HIDDEN:LENGTH * HIDDEN, :], preferred_element_type=jnp.float32
        )
        o_ref[...] = acc + b_ref[...]

    return pl.pallas_call(
        kernel,
        out_shape=jax.ShapeDtypeStruct((B, N_PAD), jnp.float32),
        in_specs=[
            pl.BlockSpec(memory_space=pl.ANY),                   # last_hidden_state stays in HBM
            pl.BlockSpec(memory_space=pltpu.MemorySpace.VMEM),   # w_pad
            pl.BlockSpec(memory_space=pltpu.MemorySpace.VMEM),   # b_pad
        ],
        out_specs=pl.BlockSpec(memory_space=pltpu.MemorySpace.VMEM),
        scratch_shapes=[
            pltpu.VMEM((B, LENGTH, HIDDEN), jnp.float32),        # gathered activations
            pltpu.SemaphoreType.DMA((2,)),
        ],
    )(last_hidden_state, w_pad, b_pad)


def init_params(embed, w, b):
    """Prepares kernel-side parameters once (bf16 cast + lane padding)."""
    w_pad = jnp.zeros((LENGTH * HIDDEN, N_PAD), jnp.bfloat16)
    w_pad = w_pad.at[:, :NUM_CLASSES].set(w.astype(jnp.bfloat16))
    b_pad = jnp.zeros((1, N_PAD), jnp.float32)
    b_pad = b_pad.at[:, :NUM_CLASSES].set(b.reshape(1, NUM_CLASSES))
    return {"embed": embed, "w_pad": w_pad, "b_pad": b_pad, "w": w, "b": b}


def forward(params, input_ids):
    """Reproduces BaseModel.forward semantics."""
    B, S = input_ids.shape
    # TODO(synk): the pretrained DeBERTa-v3 encoder (AutoModel) has no clean Pallas
    # equivalent; stand-in backbone is a deterministic embedding lookup producing
    # last_hidden_state of shape (B, S, 768).
    last_hidden_state = jnp.take(params["embed"], input_ids, axis=0)  # (B, S, 768)

    # Gather of positions (-1, -LENGTH), flatten, and Linear(2*768 -> 3) are all
    # fused in the Pallas kernel; output is lane-padded to 128 and sliced here.
    out_pad = head_gather_linear(last_hidden_state, params["w_pad"], params["b_pad"])
    return out_pad[:, :NUM_CLASSES]                                   # (B, 3)


if __name__ == "__main__":
    key = jax.random.PRNGKey(0)
    k_embed, k_w, k_b, k_ids = jax.random.split(key, 4)

    B, S, VOCAB = 2, 8, 64

    embed = jax.random.normal(k_embed, (VOCAB, HIDDEN), jnp.float32) * 0.02
    # head linear stored as (in_features, out_features) = W^T of torch Linear
    w = jax.random.normal(k_w, (LENGTH * HIDDEN, NUM_CLASSES), jnp.float32) * 0.02
    b = jax.random.normal(k_b, (NUM_CLASSES,), jnp.float32) * 0.02

    params = init_params(embed, w, b)
    input_ids = jax.random.randint(k_ids, (B, S), 0, VOCAB, dtype=jnp.int32)

    out = forward(params, input_ids)
    out = jax.block_until_ready(out)
    assert out.shape == (B, NUM_CLASSES) and out.dtype == jnp.float32

    # Pure-JAX reference (f32) of the same forward semantics.
    lhs = jnp.take(embed, input_ids, axis=0)
    pos = jnp.array([S - 1, S - LENGTH], dtype=jnp.int32)
    ref = lhs[:, pos, :].reshape(B, LENGTH * HIDDEN) @ w + b.reshape(1, NUM_CLASSES)
    assert jnp.allclose(out, ref, atol=5e-3), (out, ref)

    print("KERNEL_OK")
</pallas_src>

<mosaic_0001>
module attributes {stable_mosaic.version = 11 : i64} {
  func.func @kernel(%arg0: memref<2x8x768xf32, #tpu.memory_space<any>>, %arg1: memref<1536x128xbf16, #tpu.memory_space<vmem>>, %arg2: memref<1x128xf32, #tpu.memory_space<vmem>>, %arg3: memref<2x128xf32, #tpu.memory_space<vmem>>, %arg4: memref<2x2x768xf32, #tpu.memory_space<vmem>>, %arg5: memref<2x!tpu.dma_semaphore, #tpu.memory_space<semaphore_mem>>) attributes {dimension_semantics = [], scalar_prefetch = 0 : i64, scratch_operands = 2 : i64, tpu.core_type = #tpu.core_type<tc>} {
    %c0_i32 = arith.constant 0 : i32
    %c0_i32_0 = arith.constant 0 : i32
    %c7_i32 = arith.constant 7 : i32
    %c0_i32_1 = arith.constant 0 : i32
    %0 = tpu.memref_slice %arg0[%c0_i32_0, %c7_i32, %c0_i32_1] : memref<2x8x768xf32, #tpu.memory_space<any>> -> memref<2x1x768xf32, #tpu.memory_space<any>>
    %c0_i32_2 = arith.constant 0 : i32
    %c0_i32_3 = arith.constant 0 : i32
    %c0_i32_4 = arith.constant 0 : i32
    %1 = tpu.memref_slice %arg4[%c0_i32_2, %c0_i32_3, %c0_i32_4] : memref<2x2x768xf32, #tpu.memory_space<vmem>> -> memref<2x1x768xf32, #tpu.memory_space<vmem>>
    %2 = tpu.memref_slice %arg5[%c0_i32] : memref<2x!tpu.dma_semaphore, #tpu.memory_space<semaphore_mem>> -> memref<1x!tpu.dma_semaphore, #tpu.memory_space<semaphore_mem>>
    %3 = tpu.memref_squeeze %2 : memref<1x!tpu.dma_semaphore, #tpu.memory_space<semaphore_mem>> -> memref<!tpu.dma_semaphore, #tpu.memory_space<semaphore_mem>>
    tpu.enqueue_dma source(%0 : memref<2x1x768xf32, #tpu.memory_space<any>>) target(%1 : memref<2x1x768xf32, #tpu.memory_space<vmem>>) target_semaphore(%3 : memref<!tpu.dma_semaphore, #tpu.memory_space<semaphore_mem>>)
    %c1_i32 = arith.constant 1 : i32
    %c0_i32_5 = arith.constant 0 : i32
    %c6_i32 = arith.constant 6 : i32
    %c0_i32_6 = arith.constant 0 : i32
    %4 = tpu.memref_slice %arg0[%c0_i32_5, %c6_i32, %c0_i32_6] : memref<2x8x768xf32, #tpu.memory_space<any>> -> memref<2x1x768xf32, #tpu.memory_space<any>>
    %c0_i32_7 = arith.constant 0 : i32
    %c1_i32_8 = arith.constant 1 : i32
    %c0_i32_9 = arith.constant 0 : i32
    %5 = tpu.memref_slice %arg4[%c0_i32_7, %c1_i32_8, %c0_i32_9] : memref<2x2x768xf32, #tpu.memory_space<vmem>> -> memref<2x1x768xf32, #tpu.memory_space<vmem>>
    %6 = tpu.memref_slice %arg5[%c1_i32] : memref<2x!tpu.dma_semaphore, #tpu.memory_space<semaphore_mem>> -> memref<1x!tpu.dma_semaphore, #tpu.memory_space<semaphore_mem>>
    %7 = tpu.memref_squeeze %6 : memref<1x!tpu.dma_semaphore, #tpu.memory_space<semaphore_mem>> -> memref<!tpu.dma_semaphore, #tpu.memory_space<semaphore_mem>>
    tpu.enqueue_dma source(%4 : memref<2x1x768xf32, #tpu.memory_space<any>>) target(%5 : memref<2x1x768xf32, #tpu.memory_space<vmem>>) target_semaphore(%7 : memref<!tpu.dma_semaphore, #tpu.memory_space<semaphore_mem>>)
    %c0_i32_10 = arith.constant 0 : i32
    %c0_i32_11 = arith.constant 0 : i32
    %c7_i32_12 = arith.constant 7 : i32
    %c0_i32_13 = arith.constant 0 : i32
    %8 = tpu.memref_slice %arg0[%c0_i32_11, %c7_i32_12, %c0_i32_13] : memref<2x8x768xf32, #tpu.memory_space<any>> -> memref<2x1x768xf32, #tpu.memory_space<any>>
    %c0_i32_14 = arith.constant 0 : i32
    %c0_i32_15 = arith.constant 0 : i32
    %c0_i32_16 = arith.constant 0 : i32
    %9 = tpu.memref_slice %arg4[%c0_i32_14, %c0_i32_15, %c0_i32_16] : memref<2x2x768xf32, #tpu.memory_space<vmem>> -> memref<2x1x768xf32, #tpu.memory_space<vmem>>
    %10 = tpu.memref_slice %arg5[%c0_i32_10] : memref<2x!tpu.dma_semaphore, #tpu.memory_space<semaphore_mem>> -> memref<1x!tpu.dma_semaphore, #tpu.memory_space<semaphore_mem>>
    %11 = tpu.memref_squeeze %10 : memref<1x!tpu.dma_semaphore, #tpu.memory_space<semaphore_mem>> -> memref<!tpu.dma_semaphore, #tpu.memory_space<semaphore_mem>>
    tpu.wait_dma2 semaphore(%11 : memref<!tpu.dma_semaphore, #tpu.memory_space<semaphore_mem>>) src(%8 : memref<2x1x768xf32, #tpu.memory_space<any>>) dst(%9 : memref<2x1x768xf32, #tpu.memory_space<vmem>>)
    %c1_i32_17 = arith.constant 1 : i32
    %c0_i32_18 = arith.constant 0 : i32
    %c6_i32_19 = arith.constant 6 : i32
    %c0_i32_20 = arith.constant 0 : i32
    %12 = tpu.memref_slice %arg0[%c0_i32_18, %c6_i32_19, %c0_i32_20] : memref<2x8x768xf32, #tpu.memory_space<any>> -> memref<2x1x768xf32, #tpu.memory_space<any>>
    %c0_i32_21 = arith.constant 0 : i32
    %c1_i32_22 = arith.constant 1 : i32
    %c0_i32_23 = arith.constant 0 : i32
    %13 = tpu.memref_slice %arg4[%c0_i32_21, %c1_i32_22, %c0_i32_23] : memref<2x2x768xf32, #tpu.memory_space<vmem>> -> memref<2x1x768xf32, #tpu.memory_space<vmem>>
    %14 = tpu.memref_slice %arg5[%c1_i32_17] : memref<2x!tpu.dma_semaphore, #tpu.memory_space<semaphore_mem>> -> memref<1x!tpu.dma_semaphore, #tpu.memory_space<semaphore_mem>>
    %15 = tpu.memref_squeeze %14 : memref<1x!tpu.dma_semaphore, #tpu.memory_space<semaphore_mem>> -> memref<!tpu.dma_semaphore, #tpu.memory_space<semaphore_mem>>
    tpu.wait_dma2 semaphore(%15 : memref<!tpu.dma_semaphore, #tpu.memory_space<semaphore_mem>>) src(%12 : memref<2x1x768xf32, #tpu.memory_space<any>>) dst(%13 : memref<2x1x768xf32, #tpu.memory_space<vmem>>)
    %c0 = arith.constant 0 : index
    %c0_24 = arith.constant 0 : index
    %c0_25 = arith.constant 0 : index
    %16 = vector.load %arg4[%c0, %c0_24, %c0_25] : memref<2x2x768xf32, #tpu.memory_space<vmem>>, vector<2x1x768xf32>
    %17 = vector.shape_cast %16 : vector<2x1x768xf32> to vector<2x768xf32>
    %18 = arith.truncf %17 : vector<2x768xf32> to vector<2x768xbf16>
    %c0_26 = arith.constant 0 : index
    %c1 = arith.constant 1 : index
    %c0_27 = arith.constant 0 : index
    %19 = vector.load %arg4[%c0_26, %c1, %c0_27] : memref<2x2x768xf32, #tpu.memory_space<vmem>>, vector<2x1x768xf32>
    %20 = vector.shape_cast %19 : vector<2x1x768xf32> to vector<2x768xf32>
    %21 = arith.truncf %20 : vector<2x768xf32> to vector<2x768xbf16>
    %c0_28 = arith.constant 0 : index
    %c0_29 = arith.constant 0 : index
    %22 = vector.load %arg1[%c0_28, %c0_29] : memref<1536x128xbf16, #tpu.memory_space<vmem>>, vector<768x128xbf16>
    %cst = arith.constant dense<0.000000e+00> : vector<2x128xf32>
    %23 = tpu.matmul %18, %22, %cst {dimension_numbers = #tpu.dot_dimension_numbers<[1], [0], [0], [1], [0, 0, 1, 1], [], []>} : vector<2x768xbf16>, vector<768x128xbf16>, vector<2x128xf32> -> vector<2x128xf32>
    %c768 = arith.constant 768 : index
    %c0_30 = arith.constant 0 : index
    %24 = vector.load %arg1[%c768, %c0_30] : memref<1536x128xbf16, #tpu.memory_space<vmem>>, vector<768x128xbf16>
    %cst_31 = arith.constant dense<0.000000e+00> : vector<2x128xf32>
    %25 = tpu.matmul %21, %24, %cst_31 {dimension_numbers = #tpu.dot_dimension_numbers<[1], [0], [0], [1], [0, 0, 1, 1], [], []>} : vector<2x768xbf16>, vector<768x128xbf16>, vector<2x128xf32> -> vector<2x128xf32>
    %26 = arith.addf %23, %25 : vector<2x128xf32>
    %c0_32 = arith.constant 0 : index
    %c0_33 = arith.constant 0 : index
    %27 = vector.load %arg2[%c0_32, %c0_33] : memref<1x128xf32, #tpu.memory_space<vmem>>, vector<1x128xf32>
    %28 = vector.broadcast %27 : vector<1x128xf32> to vector<2x128xf32>
    %29 = arith.addf %26, %28 : vector<2x128xf32>
    %c0_34 = arith.constant 0 : index
    %c0_35 = arith.constant 0 : index
    %30 = vector.load %arg3[%c0_34, %c0_35] : memref<2x128xf32, #tpu.memory_space<vmem>>, vector<2x128xf32>
    tpu.vector_store %arg3[%c0_34, %c0_35], %29 {strides = array<i32>} : memref<2x128xf32, #tpu.memory_space<vmem>>, vector<2x128xf32>,
    return
  }
}

</mosaic_0001>

<bundles_post_ra>
// kernel: tpu_custom_call.1
= control target key start
LH: loop header
LB: loop body
LE: loop exit
PB: predicated region body
PF: predicated region fallthrough
CT: control target
= control target key end

     0   :  { %8 = vsyncpa [#allocation5], 0  ;;  %s1957_s0 = inlined_call_operand.hbm [shape: f32[2,8,768], index: 0, kind: input, shape index: {}]   ;;  %s1958_s1 = inlined_call_operand.hbm [shape: bf16[1536,128], index: 1, kind: input, shape index: {}]   ;;  %s1959_s2 = inlined_call_operand.vmem [shape: f32[1,128], index: 2, kind: input, shape index: {}]   ;;  %s1960_s3 = inlined_call_operand.hbm [shape: f32[2,128], index: 3, kind: output, shape index: {}]  }
   0x1   :  { %9 = vsyncpa [#allocation6], 0  ;;  %s1783_s12 = smov [#allocation4]   ;;  %s1681_s16 = scalar_lea.hbm %s1958_s1, 12288 }
   0x2   :  { %s15_s13 = sshll.u32 %s1783_s12, 4  ;;  %p1682_p0 = scmp.ne.s32.totalorder %s1958_s1, %s1681_s16  ;;  %s16_s13 = int_to_ptr.vmem [resolvable:$true] %s15_s13 }
   0x3   :  { %p1685_p1 = scmp.lt.u32.totalorder %s1681_s16, %s1958_s1 }
   0x5   :  { %p1687_p2 = pnand %p1685_p1, %p1682_p0 }
   0x7   :  { %1690 = shalt.err (!%p1687_p2)
}
   0x8   :  { %s1691_s21 = scalar_lea.vmem %s16_s13, 12288  ;;  %p1696_p4 = scmp.lt.s32.totalorder %s16_s13, %s16_s13 }
   0x9   :  { %p1692_p3 = scmp.ne.s32.totalorder %s16_s13, %s1691_s21  ;;  %p1697_p5 = scmp.lt.s32.totalorder %s1691_s21, %s1691_s21 }
   0xb   :  { %p1698_p6 = por %p1697_p5, %p1696_p4 }
   0xd   :  { %p1699_p7 = pnand %p1698_p6, %p1692_p3 }
   0xf   :  { %1702 = shalt.err (!%p1699_p7)
}
  0x10   :  { %s1784_s22 = smov 64   ;;  %s1785_s23 = smov 4  }
  0x11   :  { %21 = dma.hbm_to_vmem [thread:$0]  %s1958_s1, 12288, %s16_s13, [#allocation5], %s1784_s22, %s1784_s22, %s1785_s23  }
  0x12   :  { %1775 = dma.done.wait [#allocation5], 12288  }
  0x13   :  { %1776 = vsyncadd [#allocation5], 4294955008  ;;  %s28_s28 = scalar_lea.hbm %s1957_s0, 112  ;;  %s1786_s29 = smov [#allocation2]  }
  0x14   :  { %s30_s30 = sshll.u32 %s1786_s29, 4  ;;  %s1727_s6 = scalar_lea.hbm %s1957_s0, 304  ;;  %s1827_s30 = int_to_ptr.vmem [resolvable:$true] %s30_s30 }
  0x15   :  { %p1704_p8 = scmp.ne.s32.totalorder %s28_s28, %s1727_s6  ;;  %s1705_s9 = scalar_lea.hbm %s1957_s0, 1536 }
  0x16   :  { %p1706_p9 = scmp.lt.u32.totalorder %s28_s28, %s1957_s0  ;;  %p1707_p10 = scmp.lt.u32.totalorder %s1705_s9, %s1727_s6 }
  0x17   :  { %p1709_p12 = scmp.lt.u32.totalorder %s1727_s6, %s28_s28 }
  0x18   :  { %p1708_p11 = por %p1707_p10, %p1706_p9 }
  0x1a   :  { %p1710_p13 = por %p1709_p12, %p1708_p11 }
  0x1c   :  { %p1711_p0 = pnand %p1710_p13, %p1704_p8 }
  0x1e   :  { %1714 = shalt.err (!%p1711_p0)  }
  0x1f   :  { %s1715_s11 = scalar_lea.vmem %s1827_s30, 192  ;;  %s1719_s12 = scalar_lea.vmem %s1827_s30, 384 }
  0x20   :  { %p1716_p1 = scmp.ne.s32.totalorder %s1827_s30, %s1715_s11  ;;  %p1720_p2 = scmp.lt.s32.totalorder %s1827_s30, %s1827_s30 }
  0x21   :  { %p1721_p3 = scmp.lt.s32.totalorder %s1719_s12, %s1715_s11 }
  0x23   :  { %p1722_p4 = por %p1721_p3, %p1720_p2 }
  0x25   :  { %p1723_p5 = pnand %p1722_p4, %p1716_p1 }
  0x27   :  { %1726 = shalt.err (!%p1723_p5)  }
  0x28   :  { %s1787_s13 = smov 128   ;;  %s1788_s14 = smov 32  }
  0x29   :  { %s1789_s15 = smov 1   ;;  %s34_s18 = scalar_lea.hbm %s1957_s0, 96 }
  0x2a   :  { %33 = dma.hbm_to_vmem [thread:$0]  %s28_s28, 192, %s1827_s30, [#allocation3], %s1787_s13, %s1788_s14, %s1789_s15 }
  0x2b   :  { %s1790_s19 = smov [#allocation2 + $0x1]   ;;  %s1752_s23 = scalar_lea.hbm %s1957_s0, 288 }
  0x2c   :  { %s38_s20 = sshll.u32 %s1790_s19, 4  ;;  %p1729_p6 = scmp.ne.s32.totalorder %s34_s18, %s1752_s23  ;;  %s39_s20 = int_to_ptr.vmem [resolvable:$true] %s38_s20 }
  0x2d   :  { %p1731_p7 = scmp.lt.u32.totalorder %s34_s18, %s1957_s0  ;;  %p1732_p8 = scmp.lt.u32.totalorder %s1705_s9, %s1752_s23 }
  0x2e   :  { %p1734_p10 = scmp.lt.u32.totalorder %s1752_s23, %s34_s18 }
  0x2f   :  { %p1733_p9 = por %p1732_p8, %p1731_p7 }
  0x31   :  { %p1735_p11 = por %p1734_p10, %p1733_p9 }
  0x33   :  { %p1736_p12 = pnand %p1735_p11, %p1729_p6 }
  0x35   :  { %1739 = shalt.err (!%p1736_p12)  }
  0x36   :  { %s1740_s26 = scalar_lea.vmem %s39_s20, 192  ;;  %p1745_p0 = scmp.lt.s32.totalorder %s39_s20, %s1827_s30 }
  0x37   :  { %p1741_p13 = scmp.ne.s32.totalorder %s39_s20, %s1740_s26  ;;  %p1746_p1 = scmp.lt.s32.totalorder %s1719_s12, %s1740_s26 }
  0x39   :  { %p1747_p2 = por %p1746_p1, %p1745_p0 }
  0x3b   :  { %p1748_p3 = pnand %p1747_p2, %p1741_p13 }
  0x3d   :  { %1751 = shalt.err (!%p1748_p3)  }
  0x3e   :  { %41 = dma.hbm_to_vmem [thread:$0]  %s34_s18, 192, %s39_s20, [#allocation3 + $0x1], %s1787_s13, %s1788_s14, %s1789_s15 }
  0x3f   :  { %1777 = dma.done.wait [#allocation3], 192 }
  0x40   :  { %1778 = vsyncadd [#allocation3], 4294967104 }
  0x41   :  { %1779 = dma.done.wait [#allocation3 + $0x1], 192 }
  0x42   :  { %1780 = vsyncadd [#allocation3 + $0x1], 4294967104  ;;  %v1585_v0 = vld [vmem:[#allocation4 + $0x1c0] sm:$0xff]   ;;  %v1589_v4 = vld [vmem:[#allocation4 + $0x1c8] sm:$0xff]   ;;  %v53_v20 = vlaneseq  ;;  %vm420_vm0 = vcmask 1041409   ;;  %s1791_s28 = smov [#allocation7]  }
  0x43   :  { %v1586_v1 = vld [vmem:[#allocation4 + $0x240] sm:$0xff]   ;;  %1444 = vmatprep.subr.bf16.mxu0 %v1585_v0  ;;  %v1590_v5 = vld [vmem:[#allocation4 + $0x248] sm:$0xff]   ;;  %v1593_v8 = vld [vmem:[#allocation4 + $0x1d0] sm:$0xff]   ;;  %s1323_s29 = sshll.u32 %s1791_s28, 4  ;;  %s1324_s29 = int_to_ptr.vmem [resolvable:$true] %s1323_s29 }
  0x44   :  { %v1587_v2 = vld [vmem:[#allocation4 + $0x180] sm:$0xff]   ;;  %1466 = vmatprep.subr.bf16.mxu1 %v1586_v1  ;;  %v1591_v6 = vld [vmem:[#allocation4 + $0x188] sm:$0xff]   ;;  %v1594_v9 = vld [vmem:[#allocation4 + $0x250] sm:$0xff]   ;;  %v1854_v25 = vshrl.u32 %v53_v20, 7  ;;  %s1753_s30 = scalar_lea.vmem %s1324_s29, 32  ;;  %p1758_p5 = scmp.lt.s32.totalorder %s1324_s29, %s1324_s29 }
  0x45   :  { %v1588_v3 = vld [vmem:[#allocation4 + $0x200] sm:$0xff]   ;;  %1445 = vmatpush3.bf16.msra.mxu0 %v1587_v2  ;;  %v1592_v7 = vld [vmem:[#allocation4 + $0x208] sm:$0xff]   ;;  %v1595_v10 = vld [vmem:[#allocation4 + $0x190] sm:$0xff]   ;;  %p1754_p4 = scmp.ne.s32.totalorder %s1324_s29, %s1753_s30  ;;  %p1759_p6 = scmp.lt.s32.totalorder %s1753_s30, %s1753_s30 }
  0x46   :  { %1467 = vmatpush3.bf16.msra.mxu1 %v1588_v3  ;;  %1446 = vmatprep.subr.bf16.mxu0 %v1589_v4  ;;  %v1596_v11 = vld [vmem:[#allocation4 + $0x210] sm:$0xff]   ;;  %v1597_v12 = vld [vmem:[#allocation4 + $0x1d8] sm:$0xff]   ;;  %v1601_v16 = vld [vmem:[#allocation4 + $0x1e0] sm:$0xff]   ;;  %v1857_v30 = vsub.s32 1, %v1854_v25  ;;  %v1860_v32 = vsub.s32 3, %v1854_v25  ;;  %v1863_v34 = vsub.s32 0, %v1854_v25 }
  0x47   :  { %1468 = vmatprep.subr.bf16.mxu1 %v1590_v5  ;;  %v1598_v13 = vld [vmem:[#allocation4 + $0x258] sm:$0xff]   ;;  %v1602_v17 = vld [vmem:[#allocation4 + $0x260] sm:$0xff]   ;;  %v1605_v21 = vld [vmem:[#allocation4 + $0x1e8] sm:$0xff]   ;;  %v1866_v36 = vsub.s32 2, %v1854_v25  ;;  %v1869_v38 = vsub.s32 5, %v1854_v25  ;;  %p1760_p7 = por %p1759_p6, %p1758_p5 }
  0x48   :  { %v1599_v14 = vld [vmem:[#allocation4 + $0x198] sm:$0xff]   ;;  %v1603_v18 = vld [vmem:[#allocation4 + $0x1a0] sm:$0xff]   ;;  %v1606_v22 = vld [vmem:[#allocation4 + $0x268] sm:$0xff]  }
  0x49   :  { %1447 = vmatpush3.bf16.msra.mxu0 %v1591_v6  ;;  %v1600_v15 = vld [vmem:[#allocation4 + $0x218] sm:$0xff]   ;;  %v1604_v19 = vld [vmem:[#allocation4 + $0x220] sm:$0xff]   ;;  %v1607_v23 = vld [vmem:[#allocation4 + $0x1a8] sm:$0xff]   ;;  %p1761_p8 = pnand %p1760_p7, %p1754_p4 }
  0x4a   :  { %1469 = vmatpush3.bf16.msra.mxu1 %v1592_v7  ;;  %1448 = vmatprep.subr.bf16.mxu0 %v1593_v8  ;;  %v1608_v24 = vld [vmem:[#allocation4 + $0x228] sm:$0xff]   ;;  %v1609_v26 = vld [vmem:[#allocation4 + $0x1f0] sm:$0xff]   ;;  %v1613_v31 = vld [vmem:[#allocation4 + $0x1f8] sm:$0xff]  }
  0x4b   :  { %1470 = vmatprep.subr.bf16.mxu1 %v1594_v9  ;;  %v1610_v27 = vld [vmem:[#allocation4 + $0x270] sm:$0xff]   ;;  %v1614_v33 = vld [vmem:[#allocation4 + $0x278] sm:$0xff]   ;;  %v1617_v45 = vld [vmem:[#allocation4 + $0x2c0] sm:$0xff]  }
  0x4c   :  { %v1611_v28 = vld [vmem:[#allocation4 + $0x1b0] sm:$0xff]   ;;  %v1615_v35 = vld [vmem:[#allocation4 + $0x1b8] sm:$0xff]   ;;  %v1618_v50 = vld [vmem:[#allocation4 + $0x40] sm:$0xff]  }
  0x4d   :  { %1449 = vmatpush3.bf16.msra.mxu0 %v1595_v10  ;;  %v1612_v29 = vld [vmem:[#allocation4 + $0x230] sm:$0xff]   ;;  %v1616_v37 = vld [vmem:[#allocation4 + $0x238] sm:$0xff]   ;;  %v1619_v9 = vld [vmem:[#allocation4 + $0x280] sm:$0xff]  }
  0x4e   :  { %1471 = vmatpush3.bf16.msra.mxu1 %v1596_v11  ;;  %1450 = vmatprep.subr.bf16.mxu0 %v1597_v12  ;;  %v1871_v39 = vld [vmem:[#allocation2 + $0x1] ss:$2 sm:$0x3f]  ;;  %v1873_v40 = vld [vmem:[#allocation2 + $0xd] ss:$2 sm:$0x3f] }
  0x4f   :  { %1472 = vmatprep.subr.bf16.mxu1 %v1598_v13  ;;  %v138_v41 = vrot.slane %v1871_v39, %v1857_v30  ;;  %v162_v42 = vrot.slane %v1873_v40, %v1857_v30  ;;  %v146_v43 = vrot.slane %v1871_v39, %v1860_v32  ;;  %v170_v44 = vrot.slane %v1873_v40, %v1860_v32  ;;  %v1620_v10 = vld [vmem:[#allocation4] sm:$0xff]  }
  0x50   :  { %v134_v46 = vrot.slane %v1871_v39, %v1863_v34  ;;  %v158_v47 = vrot.slane %v1873_v40, %v1863_v34  ;;  %v142_v48 = vrot.slane %v1871_v39, %v1866_v36  ;;  %v166_v49 = vrot.slane %v1873_v40, %v1866_v36 }
  0x51   :  { %1451 = vmatpush3.bf16.msra.mxu0 %v1599_v14  ;;  %v192_v51 = vpack.c.bf16 %v138_v41, %v138_v41  ;;  %v198_v52 = vpack.c.bf16 %v162_v42, %v162_v42  ;;  %v194_v53 = vpack.c.bf16 %v146_v43, %v146_v43  ;;  %v200_v54 = vpack.c.bf16 %v170_v44, %v170_v44  ;;  %v1628_v42 = vld [vmem:[#allocation4 + $0x10] sm:$0xff]   ;;  %v1630_v44 = vld [vmem:[#allocation4 + $0x58] sm:$0xff]  }
  0x52   :  { %1473 = vmatpush3.bf16.msra.mxu1 %v1600_v15  ;;  %1452 = vmatprep.subr.bf16.mxu0 %v1601_v16  ;;  %v191_v55 = vpack.c.bf16 %v134_v46, %v134_v46  ;;  %v197_v56 = vpack.c.bf16 %v158_v47, %v158_v47  ;;  %v193_v57 = vpack.c.bf16 %v142_v48, %v142_v48  ;;  %v1632_v46 = vld [vmem:[#allocation4 + $0x18] sm:$0xff]  }
  0x53   :  { %1474 = vmatprep.subr.bf16.mxu1 %v1602_v17  ;;  %v199_v58 = vpack.c.bf16 %v166_v49, %v166_v49  ;;  %v408_v59 = vunpack.c.l.b16 %v192_v51  ;;  %v414_v60 = vunpack.c.l.b16 %v198_v52  ;;  %v410_v61 = vunpack.c.l.b16 %v194_v53  ;;  %v1633_v49 = vld [vmem:[#allocation4 + $0x2e0] sm:$0xff]  }
  0x54   :  { %v416_v62 = vunpack.c.l.b16 %v200_v54  ;;  %v407_v63 = vunpack.c.l.b16 %v191_v55  ;;  %v413_v0 = vunpack.c.l.b16 %v197_v56  ;;  %v409_v1 = vunpack.c.l.b16 %v193_v57  ;;  %v1636_v51 = vld [vmem:[#allocation4 + $0x20] sm:$0xff]   ;;  %v1637_v54 = vld [vmem:[#allocation4 + $0x2e8] sm:$0xff]  }
  0x55   :  { %1453 = vmatpush3.bf16.msra.mxu0 %v1603_v18  ;;  %v415_v2 = vunpack.c.l.b16 %v199_v58  ;;  %v422_v3 = vrot.slane %v414_v60, 7  ;;  %v154_v5 = vrot.slane %v1871_v39, %v1869_v38  ;;  %v178_v6 = vrot.slane %v1873_v40, %v1869_v38  ;;  %v1638_v55 = vld [vmem:[#allocation4 + $0x68] sm:$0xff]   ;;  %v1642_v60 = vld [vmem:[#allocation4 + $0x70] sm:$0xff]  }
  0x56   :  { %1475 = vmatpush3.bf16.msra.mxu1 %v1604_v19  ;;  %1454 = vmatprep.subr.bf16.mxu0 %v1605_v21  ;;  %v426_v4 = vrot.slane %v416_v62, 7  ;;  %v419_v7 = vrot.slane %v413_v0, 7  ;;  %v1621_v19 = vld [vmem:[#allocation4 + $0x2c8] sm:$0xff]   ;;  %v1644_v62 = vld [vmem:[#allocation4 + $0x30] sm:$0xff]  }
  0x57   :  { %1476 = vmatprep.subr.bf16.mxu1 %v1606_v22  ;;  %v424_v8 = vrot.slane %v415_v2, 7  ;;  %v423_v11 = vsel %vm420_vm0, %v422_v3, %v408_v59  ;;  %v196_v13 = vpack.c.bf16 %v154_v5, %v154_v5  ;;  %v202_v14 = vpack.c.bf16 %v178_v6, %v178_v6  ;;  %v1622_v22 = vld [vmem:[#allocation4 + $0x48] sm:$0xff]   ;;  %v1641_v59 = vld [vmem:[#allocation4 + $0x2f0] sm:$0xff]   ;;  %v1646_v6 = vld [vmem:[#allocation4 + $0x78] sm:$0xff]  }
  0x58   :  { %v427_v12 = vsel %vm420_vm0, %v426_v4, %v410_v61  ;;  %v433_v15 = vpack.c.b16 %v423_v11, %v423_v11  ;;  %v421_v17 = vsel %vm420_vm0, %v419_v7, %v407_v63  ;;  %v1639_v56 = vld [vmem:[#allocation4 + $0x2a8] sm:$0xff]   ;;  %v1643_v61 = vld [vmem:[#allocation4 + $0x2b0] sm:$0xff]  }
  0x59   :  { %1455 = vmatpush3.bf16.msra.mxu0 %v1607_v23  ;;  %v435_v16 = vpack.c.b16 %v427_v12, %v427_v12  ;;  %v425_v18 = vsel %vm420_vm0, %v424_v8, %v409_v1  ;;  %v432_v20 = vpack.c.b16 %v421_v17, %v421_v17  ;;  %v412_v23 = vunpack.c.l.b16 %v196_v13  ;;  %v1640_v57 = vld [vmem:[#allocation4 + $0x28] sm:$0xff]   ;;  %v1645_v1 = vld [vmem:[#allocation4 + $0x2f8] sm:$0xff]  }
  0x5a   :  { %1477 = vmatpush3.bf16.msra.mxu1 %v1608_v24  ;;  %1456 = vmatprep.subr.bf16.mxu0 %v1609_v26  ;;  %v434_v21 = vpack.c.b16 %v425_v18, %v425_v18  ;;  %v418_v24 = vunpack.c.l.b16 %v202_v14  ;;  %v1623_v26 = vld [vmem:[#allocation4 + $0x288] sm:$0xff]   ;;  %v1910_v2 = vld [vmem:[#allocation2 + $0xc] ss:$2 sm:$0x3f] }
  0x5b   :  { %1478 = vmatprep.subr.bf16.mxu1 %v1610_v27  ;;  %764 = vmatprep.mubr.bf16.mxu0 %v433_v15  ;;  %v1900_v27 = vsub.s32 4, %v1854_v25  ;;  %v1629_v25 = vld [vmem:[#allocation4 + $0x2d8] sm:$0xff]   ;;  %v1907_v63 = vld [vmem:[#allocation2] ss:$2 sm:$0x3f]  ;;  %v84_v7 = vrot.slane %v1910_v2, %v1857_v30  ;;  %v80_v8 = vrot.slane %v1910_v2, %v1863_v34 }
  0x5c   :  { %804 = vmatprep.mubr.bf16.mxu1 %v435_v16  ;;  %v60_v3 = vrot.slane %v1907_v63, %v1857_v30  ;;  %v56_v4 = vrot.slane %v1907_v63, %v1863_v34  ;;  %v68_v5 = vrot.slane %v1907_v63, %v1860_v32  ;;  %v76_v14 = vrot.slane %v1907_v63, %v1869_v38  ;;  %v1648_v15 = vld [vmem:[#allocation4 + $0x38] sm:$0xff]  }
  0x5d   :  { %1457 = vmatpush3.bf16.msra.mxu0 %v1611_v28  ;;  %v1624_v28 = vld [vmem:[#allocation4 + $0x8] sm:$0xff]   ;;  %v174_v43 = vrot.slane %v1873_v40, %v1900_v27  ;;  %v150_v47 = vrot.slane %v1871_v39, %v1900_v27  ;;  %v1635_v40 = vld [vmem:[#allocation4 + $0x2a0] sm:$0xff]   ;;  %v120_v16 = vpack.c.bf16 %v84_v7, %v84_v7  ;;  %v119_v17 = vpack.c.bf16 %v80_v8, %v80_v8 }
  0x5e   :  { %1479 = vmatpush3.bf16.msra.mxu1 %v1612_v29  ;;  %1458 = vmatprep.subr.bf16.mxu0 %v1613_v31  ;;  %v430_v29 = vrot.slane %v418_v24, 7  ;;  %v1625_v31 = vld [vmem:[#allocation4 + $0x2d0] sm:$0xff]   ;;  %v114_v11 = vpack.c.bf16 %v60_v3, %v60_v3  ;;  %v113_v12 = vpack.c.bf16 %v56_v4, %v56_v4  ;;  %v116_v13 = vpack.c.bf16 %v68_v5, %v68_v5  ;;  %v1662_v3 = vld [vmem:[#allocation4 + $0x158] sm:$0xff]   ;;  %v1665_v5 = vld [vmem:[#allocation4 + $0xe0] sm:$0xff]  }
  0x5f   :  { %1480 = vmatprep.subr.bf16.mxu1 %v1614_v33  ;;  %v1626_v33 = vld [vmem:[#allocation4 + $0x50] sm:$0xff]   ;;  %v201_v48 = vpack.c.bf16 %v174_v43, %v174_v43  ;;  %v195_v52 = vpack.c.bf16 %v150_v47, %v150_v47  ;;  %v100_v30 = vrot.slane %v1910_v2, %v1869_v38  ;;  %v88_v38 = vrot.slane %v1910_v2, %v1866_v36  ;;  %v1653_v47 = vld [vmem:[#allocation4 + $0xc8] sm:$0xff]   ;;  %v1663_v4 = vld [vmem:[#allocation4 + $0x98] sm:$0xff]  }
  0x60   :  { %v865_v34 = vunpack.c.l.b16 %v114_v11  ;;  %v96_v7 = vrot.slane %v1910_v2, %v1900_v27  ;;  %v1666_v8 = vld [vmem:[#allocation4 + $0x160] sm:$0xff]  }
  0x61   :  { %1459 = vmatpush3.bf16.msra.mxu0 %v1615_v35  ;;  %v431_v35 = vsel %vm420_vm0, %v430_v29, %v412_v23  ;;  %v417_v53 = vunpack.c.l.b16 %v201_v48  ;;  %v411_v39 = vunpack.c.l.b16 %v195_v52  ;;  %v1650_v23 = vld [vmem:[#allocation4 + $0x140] sm:$0xff]   ;;  %v867_v29 = vunpack.c.l.b16 %v116_v13 }
  0x62   :  { %1481 = vmatpush3.bf16.msra.mxu1 %v1616_v37  ;;  %1488 = vmatprep.subr.bf16.mxu0 %v1617_v45  ;;  %v1627_v37 = vld [vmem:[#allocation4 + $0x290] sm:$0xff]   ;;  %v437_v41 = vpack.c.b16 %v431_v35, %v431_v35  ;;  %v1631_v45 = vld [vmem:[#allocation4 + $0x298] sm:$0xff]   ;;  %v1668_v11 = vld [vmem:[#allocation4 + $0x120] sm:$0xff]   ;;  %v123_v13 = vpack.c.bf16 %v96_v7, %v96_v7 }
  0x63   :  { %1510 = vmatprep.subr.bf16.mxu1 %v1618_v50  ;;  %v1634_v50 = vld [vmem:[#allocation4 + $0x60] sm:$0xff]   ;;  %v428_v58 = vrot.slane %v417_v53, 7 }
  0x64   :  { %765 = vmatmul.mubr.bf16.vlgmr.msra.gmra.mrb[0].mxu0 %v432_v20  ;;  %v1649_v20 = vld [vmem:[#allocation4 + $0xc0] sm:$0xff]  }
  0x65   :  { %805 = vmatmul.mubr.bf16.vlgmr.msra.gmra.mrb[0].mxu1 %v434_v21  ;;  %1489 = vmatpush3.bf16.msra.mxu0 %v1619_v9  ;;  %v429_v0 = vsel %vm420_vm0, %v428_v58, %v411_v39  ;;  %v92_v9 = vrot.slane %v1910_v2, %v1860_v32  ;;  %v118_v32 = vpack.c.bf16 %v76_v14, %v76_v14  ;;  %v871_v21 = vunpack.c.l.b16 %v120_v16  ;;  %v1657_v39 = vld [vmem:[#allocation4 + $0xd0] sm:$0xff]   ;;  %v1670_v14 = vld [vmem:[#allocation4 + $0x168] sm:$0xff]  }
  0x66   :  { %1511 = vmatpush3.bf16.msra.mxu1 %v1620_v10  ;;  %1490 = vmatprep.subr.bf16.mxu0 %v1621_v19  ;;  %v1647_v10 = vld [vmem:[#allocation4 + $0x2b8] sm:$0xff]   ;;  %v864_v19 = vunpack.c.l.b16 %v113_v12  ;;  %v72_v12 = vrot.slane %v1907_v63, %v1900_v27  ;;  %v1673_v16 = vld [vmem:[#allocation4 + $0xf0] sm:$0xff]   ;;  %v1672_v2 = vld [vmem:[#allocation4 + $0x128] sm:$0xff]  }
  0x67   :  { %1512 = vmatprep.subr.bf16.mxu1 %v1622_v22  ;;  %844 = vmatprep.mubr.bf16.mxu0 %v437_v41  ;;  %v122_v18 = vpack.c.bf16 %v92_v9, %v92_v9  ;;  %v870_v22 = vunpack.c.l.b16 %v119_v17  ;;  %v1667_v9 = vld [vmem:[#allocation4 + $0xa0] sm:$0xff]  }
  0x68   :  { %v117_v17 = vpack.c.bf16 %v72_v12, %v72_v12 }
  0x69   :  { %1491 = vmatpush3.bf16.msra.mxu0 %v1623_v26  ;;  %v873_v24 = vunpack.c.l.b16 %v122_v18  ;;  %v124_v26 = vpack.c.bf16 %v100_v30, %v100_v30  ;;  %v876_v35 = vrot.slane %v870_v22, 7  ;;  %v874_v18 = vunpack.c.l.b16 %v123_v13  ;;  %v1674_v30 = vld [vmem:[#allocation4 + $0x170] sm:$0xff]   ;;  %v1680_v22 = vld [vmem:[#allocation4 + $0x138] sm:$0xff]  }
  0x6a   :  { %1513 = vmatpush3.bf16.msra.mxu1 %v1624_v28  ;;  %1492 = vmatprep.subr.bf16.mxu0 %v1625_v31  ;;  %v436_v28 = vpack.c.b16 %v429_v0, %v429_v0  ;;  %v64_v31 = vrot.slane %v1907_v63, %v1866_v36  ;;  %v1661_v0 = vld [vmem:[#allocation4 + $0xd8] sm:$0xff]   ;;  %v868_v27 = vunpack.c.l.b16 %v117_v17 }
  0x6b   :  { %1514 = vmatprep.subr.bf16.mxu1 %v1626_v33  ;;  %v878_v33 = vrot.slane %v871_v21, 7  ;;  %v875_v41 = vunpack.c.l.b16 %v124_v26  ;;  %v882_v43 = vrot.slane %v873_v24, 7  ;;  %v884_v63 = vrot.slane %v874_v18, 7  ;;  %v1679_v21 = vld [vmem:[#allocation4 + $0xb8] sm:$0xff]  }
  0x6d   :  { %1493 = vmatpush3.bf16.msra.mxu0 %v1627_v37  ;;  %v869_v37 = vunpack.c.l.b16 %v118_v32  ;;  %v886_v48 = vrot.slane %v875_v41, 7  ;;  %v1678_v32 = vld [vmem:[#allocation4 + $0x178] sm:$0xff]  }
  0x6e   :  { %1515 = vmatpush3.bf16.msra.mxu1 %v1628_v42  ;;  %1494 = vmatprep.subr.bf16.mxu0 %v1629_v25  ;;  %v1651_v42 = vld [vmem:[#allocation4 + $0x80] sm:$0xff]   ;;  %v115_v25 = vpack.c.bf16 %v64_v31, %v64_v31 }
  0x6f   :  { %1516 = vmatprep.subr.bf16.mxu1 %v1630_v44  ;;  %v121_v44 = vpack.c.bf16 %v88_v38, %v88_v38  ;;  %v887_v53 = vsel %vm420_vm0, %v886_v48, %v869_v37 }
  0x71   :  { %1495 = vmatpush3.bf16.msra.mxu0 %v1631_v45  ;;  %v879_v45 = vsel %vm420_vm0, %v878_v33, %v865_v34  ;;  %v1675_v34 = vld [vmem:[#allocation4 + $0xb0] sm:$0xff]  }
  0x72   :  { %1517 = vmatpush3.bf16.msra.mxu1 %v1632_v46  ;;  %1496 = vmatprep.subr.bf16.mxu0 %v1633_v49  ;;  %v877_v46 = vsel %vm420_vm0, %v876_v35, %v864_v19  ;;  %v889_v49 = vpack.c.b16 %v879_v45, %v879_v45  ;;  %v1677_v19 = vld [vmem:[#allocation4 + $0xf8] sm:$0xff]  }
  0x73   :  { %1518 = vmatprep.subr.bf16.mxu1 %v1634_v50  ;;  %v888_v36 = vpack.c.b16 %v877_v46, %v877_v46  ;;  %v1652_v50 = vld [vmem:[#allocation4 + $0x100] sm:$0xff]  }
  0x74   :  { %1220 = vmatprep.mubr.bf16.mxu1 %v889_v49 }
  0x75   :  { %1497 = vmatpush3.bf16.msra.mxu0 %v1635_v40  ;;  %v883_v40 = vsel %vm420_vm0, %v882_v43, %v867_v29 }
  0x76   :  { %1519 = vmatpush3.bf16.msra.mxu1 %v1636_v51  ;;  %1498 = vmatprep.subr.bf16.mxu0 %v1637_v54  ;;  %v1654_v51 = vld [vmem:[#allocation4 + $0x148] sm:$0xff]   ;;  %v891_v52 = vpack.c.b16 %v883_v40, %v883_v40  ;;  %v866_v54 = vunpack.c.l.b16 %v115_v25 }
  0x77   :  { %1520 = vmatprep.subr.bf16.mxu1 %v1638_v55  ;;  %v872_v55 = vunpack.c.l.b16 %v121_v44 }
  0x79   :  { %1499 = vmatpush3.bf16.msra.mxu0 %v1639_v56  ;;  %v1655_v56 = vld [vmem:[#allocation4 + $0x88] sm:$0xff]   ;;  %v880_v58 = vrot.slane %v872_v55, 7 }
  0x7a   :  { %1521 = vmatpush3.bf16.msra.mxu1 %v1640_v57  ;;  %1500 = vmatprep.subr.bf16.mxu0 %v1641_v59  ;;  %v893_v57 = vpack.c.b16 %v887_v53, %v887_v53  ;;  %v1656_v59 = vld [vmem:[#allocation4 + $0x108] sm:$0xff]  }
  0x7b   :  { %1522 = vmatprep.subr.bf16.mxu1 %v1642_v60  ;;  %v1658_v60 = vld [vmem:[#allocation4 + $0x150] sm:$0xff]  }
  0x7d   :  { %1501 = vmatpush3.bf16.msra.mxu0 %v1643_v61  ;;  %v881_v61 = vsel %vm420_vm0, %v880_v58, %v866_v54 }
  0x7e   :  { %1523 = vmatpush3.bf16.msra.mxu1 %v1644_v62  ;;  %1502 = vmatprep.subr.bf16.mxu0 %v1645_v1  ;;  %v1659_v62 = vld [vmem:[#allocation4 + $0x90] sm:$0xff]   ;;  %v890_v24 = vpack.c.b16 %v881_v61, %v881_v61 }
  0x7f   :  { %1524 = vmatprep.subr.bf16.mxu1 %v1646_v6  ;;  %v1660_v1 = vld [vmem:[#allocation4 + $0x110] sm:$0xff]   ;;  %v1664_v6 = vld [vmem:[#allocation4 + $0x118] sm:$0xff]  }
  0x81   :  { %1503 = vmatpush3.bf16.msra.mxu0 %v1647_v10  ;;  %v1669_v10 = vld [vmem:[#allocation4 + $0xe8] sm:$0xff]  }
  0x82   :  { %1525 = vmatpush3.bf16.msra.mxu1 %v1648_v15  ;;  %1532 = vmatprep.subr.bf16.mxu0 %v1649_v20  ;;  %v1671_v15 = vld [vmem:[#allocation4 + $0xa8] sm:$0xff]   ;;  %v1676_v20 = vld [vmem:[#allocation4 + $0x130] sm:$0xff]  }
  0x83   :  { %1554 = vmatprep.subr.bf16.mxu1 %v1650_v23  ;;  %v885_v23 = vsel %vm420_vm0, %v884_v63, %v868_v27 }
  0x84   :  { %845 = vmatmul.mubr.bf16.vlgmr.msra.gmra.mrb[4].mxu0 %v436_v28  ;;  %v892_v26 = vpack.c.b16 %v885_v23, %v885_v23 }
  0x85   :  { %1533 = vmatpush3.bf16.msra.mxu0 %v1651_v42  ;;  %1221 = vmatmul.mubr.bf16.vlgmr.msra.gmra.mrb[4].mxu1 %v888_v36 }
  0x86   :  { %1534 = vmatprep.subr.bf16.mxu0 %v1653_v47  ;;  %1555 = vmatpush3.bf16.msra.mxu1 %v1652_v50 }
  0x87   :  { %1260 = vmatprep.mubr.bf16.mxu0 %v891_v52  ;;  %1556 = vmatprep.subr.bf16.mxu1 %v1654_v51 }
  0x88   :  { %1300 = vmatprep.mubr.bf16.mxu1 %v893_v57 }
  0x89   :  { %1535 = vmatpush3.bf16.msra.mxu0 %v1655_v56 }
  0x8a   :  { %1536 = vmatprep.subr.bf16.mxu0 %v1657_v39  ;;  %1557 = vmatpush3.bf16.msra.mxu1 %v1656_v59 }
  0x8b   :  { %1558 = vmatprep.subr.bf16.mxu1 %v1658_v60 }
  0x8d   :  { %1537 = vmatpush3.bf16.msra.mxu0 %v1659_v62 }
  0x8e   :  { %1538 = vmatprep.subr.bf16.mxu0 %v1661_v0  ;;  %1559 = vmatpush3.bf16.msra.mxu1 %v1660_v1  ;;  %v1441_v1 = vld [vmem:[%s1959_s2] ss:$0 sm:$0xff] }
  0x8f   :  { %1560 = vmatprep.subr.bf16.mxu1 %v1662_v3 }
  0x91   :  { %1539 = vmatpush3.bf16.msra.mxu0 %v1663_v4 }
  0x92   :  { %1540 = vmatprep.subr.bf16.mxu0 %v1665_v5  ;;  %1561 = vmatpush3.bf16.msra.mxu1 %v1664_v6 }
  0x93   :  { %1562 = vmatprep.subr.bf16.mxu1 %v1666_v8 }
  0x95   :  { %1541 = vmatpush3.bf16.msra.mxu0 %v1667_v9 }
  0x96   :  { %1542 = vmatprep.subr.bf16.mxu0 %v1669_v10  ;;  %1563 = vmatpush3.bf16.msra.mxu1 %v1668_v11 }
  0x97   :  { %1564 = vmatprep.subr.bf16.mxu1 %v1670_v14 }
  0x99   :  { %1543 = vmatpush3.bf16.msra.mxu0 %v1671_v15 }
  0x9a   :  { %1544 = vmatprep.subr.bf16.mxu0 %v1673_v16  ;;  %1565 = vmatpush3.bf16.msra.mxu1 %v1672_v2 }
  0x9b   :  { %1566 = vmatprep.subr.bf16.mxu1 %v1674_v30 }
  0x9d   :  { %1545 = vmatpush3.bf16.msra.mxu0 %v1675_v34 }
  0x9e   :  { %1546 = vmatprep.subr.bf16.mxu0 %v1677_v19  ;;  %1567 = vmatpush3.bf16.msra.mxu1 %v1676_v20 }
  0x9f   :  { %1568 = vmatprep.subr.bf16.mxu1 %v1678_v32 }
  0xa1   :  { %1547 = vmatpush3.bf16.msra.mxu0 %v1679_v21 }
  0xa2   :  { %1569 = vmatpush3.bf16.msra.mxu1 %v1680_v22 }
  0xa4   :  { %1261 = vmatmul.mubr.bf16.vlgmr.msra.gmra.mrb[8].mxu0 %v890_v24 }
  0xa5   :  { %1301 = vmatmul.mubr.bf16.vlgmr.msra.gmra.mrb[8].mxu1 %v892_v26 }
 0x137   :  { %v1460_v28 = vpop.f32.mrb[0].mxu0 }
 0x138   :  { %v1482_v29 = vpop.f32.mrb[0].mxu1  ;;  %v1461_v31 = vpop.f32.mrb[1].mxu0 }
 0x139   :  { %v1483_v38 = vpop.f32.mrb[1].mxu1  ;;  %v1462_v33 = vadd.f32 %v1461_v31, %v1460_v28  ;;  %v1463_v37 = vpop.f32.mrb[2].mxu0 }
 0x13a   :  { %v1484_v35 = vadd.f32 %v1483_v38, %v1482_v29  ;;  %v1485_v41 = vpop.f32.mrb[2].mxu1  ;;  %v1464_v42 = vpop.f32.mrb[3].mxu0 }
 0x13b   :  { %v1486_v43 = vpop.f32.mrb[3].mxu1 }
 0x13c   :  { %v807_v25 = vadd.f32 %v1484_v35, %v1462_v33 }
 0x157   :  { %v1504_v44 = vpop.f32.mrb[4].mxu0 }
 0x158   :  { %v1505_v45 = vpop.f32.mrb[5].mxu0  ;;  %v1526_v46 = vpop.f32.mrb[4].mxu1 }
 0x159   :  { %v1506_v47 = vadd.f32 %v1505_v45, %v1504_v44  ;;  %v1507_v48 = vpop.f32.mrb[6].mxu0  ;;  %v1527_v49 = vpop.f32.mrb[5].mxu1 }
 0x15a   :  { %v1508_v36 = vpop.f32.mrb[7].mxu0  ;;  %v1528_v40 = vadd.f32 %v1527_v49, %v1526_v46  ;;  %v1529_v51 = vpop.f32.mrb[6].mxu1 }
 0x15b   :  { %v847_v50 = vadd.f32 %v1506_v47, %v807_v25  ;;  %v1530_v52 = vpop.f32.mrb[7].mxu1 }
 0x15d   :  { %v1223_v53 = vadd.f32 %v1528_v40, %v847_v50 }
 0x177   :  { %v1548_v54 = vpop.f32.mrb[8].mxu0 }
 0x178   :  { %v1549_v55 = vpop.f32.mrb[9].mxu0  ;;  %v1570_v56 = vpop.f32.mrb[8].mxu1 }
 0x179   :  { %v1550_v57 = vadd.f32 %v1549_v55, %v1548_v54  ;;  %v1551_v39 = vpop.f32.mrb[10].mxu0  ;;  %v1571_v58 = vpop.f32.mrb[9].mxu1 }
 0x17a   :  { %v1552_v59 = vpop.f32.mrb[11].mxu0  ;;  %v1572_v61 = vadd.f32 %v1571_v58, %v1570_v56  ;;  %v1573_v62 = vpop.f32.mrb[10].mxu1 }
 0x17b   :  { %v1263_v60 = vadd.f32 %v1550_v57, %v1223_v53  ;;  %v1574_v0 = vpop.f32.mrb[11].mxu1 }
 0x17d   :  { %v1303_v3 = vadd.f32 %v1572_v61, %v1263_v60 }
 0x17f   :  { %v1315_v4 = vadd.f32 %v1441_v1, %v1303_v3 }
 0x181   :  { %1316 = vst [vmem:[#allocation7] sm:$0x3] %v1315_v4 }
 0x182   :  { %1764 = shalt.err (!%p1761_p8)
}
 0x183   :  { %s1765_s6 = scalar_lea.hbm %s1960_s3, 32 }
 0x184   :  { %p1766_p9 = scmp.ne.s32.totalorder %s1960_s3, %s1765_s6  ;;  %p1769_p10 = scmp.lt.u32.totalorder %s1765_s6, %s1960_s3 }
 0x186   :  { %p1771_p11 = pnand %p1769_p10, %p1766_p9 }
 0x188   :  { %1774 = shalt.err (!%p1771_p11)
}
 0x189   :  { %1326 = dma.vmem_to_hbm [thread:$0]  %s1324_s29, 32, %s1960_s3, [#allocation6]  }
 0x18a   :  { %1781 = dma.done.wait [#allocation6], 32  }
 0x18b   :  { %1782 = vsyncadd [#allocation6], 4294967264 }
 0x18c   :  { %1330 = vsyncpa [#allocation5], 1 }
 0x18d   :  { %1331 = vsyncpa [#allocation6], 1 }
 0x18e   :  { %1332 = vsyncmov [#allocation3] }
 0x191   :  { %s1333_s11 = vpop.sfrf %1332 }
 0x192   :  { %p1442_p12 = scmp.ne.s32.totalorder %s1333_s11, 0 }
 0x194   :  { %1337 = shalt.err (%p1442_p12)  }
 0x195   :  { %1339 = vsyncmov [#allocation3 + $0x1] }
 0x198   :  { %s1340_s12 = vpop.sfrf %1339 }
 0x199   :  { %p1443_p13 = scmp.ne.s32.totalorder %s1340_s12, 0 }
 0x19b   :  { %1344 = shalt.err (%p1443_p13)  }

</bundles_post_ra>
